<compile_context>
chip_gen: v7x
topology: tpu7x:2x2x1
jax: 0.10.0
libtpu: 0.0.40
codegen_flags: <defaults>
</compile_context>

<pallas_src>
import functools

import jax
import jax.numpy as jnp
from jax import lax
from jax.experimental import pallas as pl
from jax.experimental.pallas import tpu as pltpu


def _round_up(x, m):
    return (x + m - 1) // m * m


def pdf_flow_layer3_kernel(alpha_ref, beta_ref, xt_ref, m_ref, slab_ref, *, ndims):
    a = alpha_ref[0]
    beta = beta_ref[0]

    # z = [x | t | 1 | 0...] @ [A ; W^T ; b ; 0...]  -- single fused MXU pass;
    # output is already lane-padded to L (zero in the padding columns).
    z = jnp.dot(xt_ref[...], m_ref[...], preferred_element_type=jnp.float32)

    a2 = a * a
    a2p1 = a2 + jnp.float32(1.0)
    a2p2 = a2 + jnp.float32(2.0)

    q = a2p2 * z * z + beta * beta
    r = lax.rsqrt(q)                      # one EUP op (replaces sqrt + divide)
    s = q * r                             # == sqrt(q)

    out = a2p1 * z + a * s
    dz = a2p1 + a * a2p2 * z * r          # analytic HyperReLU derivative (> 0)

    bm, L = slab_ref.shape
    col = lax.broadcasted_iota(jnp.int32, (bm, L), 1)
    valid = col < ndims                   # mask off the lane-padding columns

    logdet = jnp.sum(jnp.where(valid, jnp.log(dz), jnp.float32(0.0)),
                     axis=-1, keepdims=True)

    # Lane-dense combined output slab: cols [0, D) = out, col D = logdet, rest 0.
    slab_ref[...] = jnp.where(
        valid, out, jnp.where(col == ndims, logdet, jnp.float32(0.0)))


def pdf_flow_layer3(t, x, A, W, b, alpha, beta, *, bm=None):
    """Direct-mode forward of PDFFlowLayer3. Returns (out [B,D], logdet [B,1])."""
    B, D = x.shape
    P = t.shape[1]

    Din = D + P + 1                       # [x | t | 1]
    Din_pad = _round_up(Din, 8)           # sublane-align the contraction dim
    L = _round_up(D + 1, 128)             # lane-dense output width (>= 128)

    B_pad = _round_up(B, 8)               # sublane-align the batch
    if bm is None:
        cap = 1024                        # big tiles: kernel is overhead-bound
        if B_pad <= cap:
            bm = B_pad
        else:
            bm = max(d for d in range(8, cap + 1, 8) if B_pad % d == 0)
    assert B_pad % bm == 0 and bm % 8 == 0

    # Wrapper-side fusion: one input slab and one stacked weight matrix.
    xt = jnp.zeros((B_pad, Din_pad), jnp.float32)
    xt = xt.at[:B, :D].set(x.astype(jnp.float32))
    xt = xt.at[:B, D:D + P].set(t.astype(jnp.float32))
    xt = xt.at[:B, D + P].set(1.0)

    M = jnp.zeros((Din_pad, L), jnp.float32)
    M = M.at[:D, :D].set(A.astype(jnp.float32))              # x @ A
    M = M.at[D:D + P, :D].set(W.astype(jnp.float32).T)       # t @ W^T
    M = M.at[D + P, :D].set(b.astype(jnp.float32))           # + b

    slab = pl.pallas_call(
        functools.partial(pdf_flow_layer3_kernel, ndims=D),
        out_shape=jax.ShapeDtypeStruct((B_pad, L), jnp.float32),
        grid_spec=pltpu.PrefetchScalarGridSpec(
            num_scalar_prefetch=0,
            grid=(B_pad // bm,),
            in_specs=[
                pl.BlockSpec(memory_space=pltpu.MemorySpace.SMEM),    # alpha (1,)
                pl.BlockSpec(memory_space=pltpu.MemorySpace.SMEM),    # beta  (1,)
                pl.BlockSpec((bm, Din_pad), lambda i: (i, 0)),        # [x|t|1]
                pl.BlockSpec((Din_pad, L), lambda i: (0, 0)),         # [A;W^T;b]
            ],
            out_specs=pl.BlockSpec((bm, L), lambda i: (i, 0)),        # lane-dense slab
        ),
        compiler_params=pltpu.CompilerParams(
            dimension_semantics=("parallel",)),
    )(alpha, beta, xt, M)

    out = slab[:B, :D]
    logdet = slab[:B, D:D + 1]
    return out, logdet


def pdf_flow_layer3_ref(t, x, A, W, b, alpha, beta):
    """Pure-JAX reference of the same forward pass."""
    a = alpha[0]
    be = beta[0]
    z = x @ A + t @ W.T + b
    s = jnp.sqrt((a * a + 2.0) * z * z + be * be)
    out = (a * a + 1.0) * z + a * s
    dz = (a * a + 1.0) + a * (a * a + 2.0) * z / s
    return out, jnp.sum(jnp.log(dz), axis=-1, keepdims=True)


if __name__ == "__main__":
    B, D, P = 8, 16, 8          # batch, ndims, nparams

    key = jax.random.PRNGKey(0)
    ks = jax.random.split(key, 7)

    # inputs
    x = jax.random.normal(ks[0], (B, D), jnp.float32)
    t = jax.random.normal(ks[1], (B, P), jnp.float32)

    # parameters (deterministic, matching the module's __init__ shapes)
    A = jax.random.normal(ks[2], (D, D), jnp.float32)                       # InvertibleLinearMap2.A
    W = jax.random.normal(ks[3], (D, P), jnp.float32) / jnp.sqrt(float(D))  # LinearDegenerate.weight
    b = jax.random.normal(ks[4], (D,), jnp.float32) / jnp.sqrt(float(D))    # LinearDegenerate.bias
    alpha = jax.random.normal(ks[5], (1,), jnp.float32) / 3.0               # HyperReLU.alpha
    beta = jax.random.uniform(ks[6], (1,), jnp.float32)                     # HyperReLU.beta

    out, logdet = pdf_flow_layer3(t, x, A, W, b, alpha, beta)
    jax.block_until_ready((out, logdet))

    out_r, logdet_r = pdf_flow_layer3_ref(t, x, A, W, b, alpha, beta)
    assert out.shape == (B, D) and logdet.shape == (B, 1)
    assert jnp.allclose(out, out_r, atol=1e-4, rtol=1e-4)
    assert jnp.allclose(logdet, logdet_r, atol=1e-4, rtol=1e-4)

    print("KERNEL_OK")
</pallas_src>

<mosaic_0001>
module attributes {stable_mosaic.version = 11 : i64} {
  func.func @pdf_flow_layer3_kernel(%arg0: i32, %arg1: memref<1xf32, #tpu.memory_space<smem>>, %arg2: memref<1xf32, #tpu.memory_space<smem>>, %arg3: memref<8x32xf32, #tpu.memory_space<vmem>>, %arg4: memref<32x128xf32, #tpu.memory_space<vmem>>, %arg5: memref<8x128xf32, #tpu.memory_space<vmem>>) attributes {dimension_semantics = [#tpu.dimension_semantics<parallel>], iteration_bounds = array<i64: 1>, scalar_prefetch = 0 : i64, scratch_operands = 0 : i64, tpu.core_type = #tpu.core_type<tc>, window_params = [{transform_indices = @transform_0, window_bounds = array<i64: 1>}, {transform_indices = @transform_1, window_bounds = array<i64: 1>}, {transform_indices = @transform_2, window_bounds = array<i64: 8, 32>}, {pipeline_mode = #tpu.pipeline_mode<synchronous>, transform_indices = @transform_3, window_bounds = array<i64: 32, 128>}, {transform_indices = @transform_4, window_bounds = array<i64: 8, 128>}]} {
    %c0 = arith.constant 0 : index
    %0 = memref.load %arg1[%c0] : memref<1xf32, #tpu.memory_space<smem>>
    %c0_0 = arith.constant 0 : index
    %1 = memref.load %arg2[%c0_0] : memref<1xf32, #tpu.memory_space<smem>>
    %c0_1 = arith.constant 0 : index
    %c0_2 = arith.constant 0 : index
    %2 = vector.load %arg3[%c0_1, %c0_2] : memref<8x32xf32, #tpu.memory_space<vmem>>, vector<8x32xf32>
    %c0_3 = arith.constant 0 : index
    %c0_4 = arith.constant 0 : index
    %3 = vector.load %arg4[%c0_3, %c0_4] : memref<32x128xf32, #tpu.memory_space<vmem>>, vector<32x128xf32>
    %cst = arith.constant dense<0.000000e+00> : vector<8x128xf32>
    %4 = tpu.matmul %2, %3, %cst {dimension_numbers = #tpu.dot_dimension_numbers<[1], [0], [0], [1], [0, 0, 1, 1], [], []>} : vector<8x32xf32>, vector<32x128xf32>, vector<8x128xf32> -> vector<8x128xf32>
    %5 = arith.mulf %0, %0 : f32
    %cst_5 = arith.constant 1.000000e+00 : f32
    %6 = arith.addf %5, %cst_5 : f32
    %cst_6 = arith.constant 2.000000e+00 : f32
    %7 = arith.addf %5, %cst_6 : f32
    %8 = vector.broadcast %7 : f32 to vector<8x128xf32>
    %9 = arith.mulf %8, %4 : vector<8x128xf32>
    %10 = arith.mulf %9, %4 : vector<8x128xf32>
    %11 = arith.mulf %1, %1 : f32
    %12 = vector.broadcast %11 : f32 to vector<8x128xf32>
    %13 = arith.addf %10, %12 : vector<8x128xf32>
    %14 = math.rsqrt %13 : vector<8x128xf32>
    %15 = arith.mulf %13, %14 : vector<8x128xf32>
    %16 = vector.broadcast %6 : f32 to vector<8x128xf32>
    %17 = arith.mulf %16, %4 : vector<8x128xf32>
    %18 = vector.broadcast %0 : f32 to vector<8x128xf32>
    %19 = arith.mulf %18, %15 : vector<8x128xf32>
    %20 = arith.addf %17, %19 : vector<8x128xf32>
    %21 = arith.mulf %0, %7 : f32
    %22 = vector.broadcast %21 : f32 to vector<8x128xf32>
    %23 = arith.mulf %22, %4 : vector<8x128xf32>
    %24 = arith.mulf %23, %14 : vector<8x128xf32>
    %25 = vector.broadcast %6 : f32 to vector<8x128xf32>
    %26 = arith.addf %25, %24 : vector<8x128xf32>
    %27 = tpu.iota {dimensions = array<i32: 1>} : vector<8x128xi32>
    %c16_i32 = arith.constant 16 : i32
    %28 = vector.broadcast %c16_i32 : i32 to vector<8x128xi32>
    %29 = arith.cmpi slt, %27, %28 : vector<8x128xi32>
    %30 = math.log %26 : vector<8x128xf32>
    %cst_7 = arith.constant 0.000000e+00 : f32
    %31 = vector.broadcast %cst_7 : f32 to vector<8x128xf32>
    %32 = arith.select %29, %30, %31 : vector<8x128xi1>, vector<8x128xf32>
    %cst_8 = arith.constant dense<0.000000e+00> : vector<8xf32>
    %33 = vector.multi_reduction <add>, %32, %cst_8 [1] : vector<8x128xf32> to vector<8xf32>
    %34 = vector.shape_cast %33 : vector<8xf32> to vector<8x1xf32>
    %c16_i32_9 = arith.constant 16 : i32
    %35 = vector.broadcast %c16_i32_9 : i32 to vector<8x128xi32>
    %36 = arith.cmpi eq, %27, %35 : vector<8x128xi32>
    %cst_10 = arith.constant 0.000000e+00 : f32
    %37 = vector.shape_cast %34 : vector<8x1xf32> to vector<8x1xf32>
    %38 = vector.broadcast %37 : vector<8x1xf32> to vector<8x128xf32>
    %39 = vector.broadcast %cst_10 : f32 to vector<8x128xf32>
    %40 = arith.select %36, %38, %39 : vector<8x128xi1>, vector<8x128xf32>
    %41 = arith.select %29, %20, %40 : vector<8x128xi1>, vector<8x128xf32>
    %c0_11 = arith.constant 0 : index
    %c0_12 = arith.constant 0 : index
    %42 = vector.load %arg5[%c0_11, %c0_12] : memref<8x128xf32, #tpu.memory_space<vmem>>, vector<8x128xf32>
    tpu.vector_store %arg5[%c0_11, %c0_12], %41 {strides = array<i32>} : memref<8x128xf32, #tpu.memory_space<vmem>>, vector<8x128xf32>,
    return
  }
  func.func @transform_0(%arg0: i32) -> i32 {
    %c0_i32 = arith.constant 0 : i32
    %c0_i32_0 = arith.constant 0 : i32
    return %c0_i32 : i32
  }
  func.func @transform_1(%arg0: i32) -> i32 {
    %c0_i32 = arith.constant 0 : i32
    %c0_i32_0 = arith.constant 0 : i32
    return %c0_i32 : i32
  }
  func.func @transform_2(%arg0: i32) -> (i32, i32) {
    %c0_i32 = arith.constant 0 : i32
    %c0_i32_0 = arith.constant 0 : i32
    return %arg0, %c0_i32 : i32, i32
  }
  func.func @transform_3(%arg0: i32) -> (i32, i32) {
    %c0_i32 = arith.constant 0 : i32
    %c0_i32_0 = arith.constant 0 : i32
    %c0_i32_1 = arith.constant 0 : i32
    return %c0_i32, %c0_i32_0 : i32, i32
  }
  func.func @transform_4(%arg0: i32) -> (i32, i32) {
    %c0_i32 = arith.constant 0 : i32
    %c0_i32_0 = arith.constant 0 : i32
    return %arg0, %c0_i32 : i32, i32
  }
}

</mosaic_0001>

<bundles_post_ra>
// kernel: tpu_custom_call.1
= control target key start
LH: loop header
LB: loop body
LE: loop exit
PB: predicated region body
PF: predicated region fallthrough
CT: control target
= control target key end

     0   :  { %11 = vsyncpa [#allocation5], 0  ;;  %s373_s0 = inlined_call_operand.<no memory space> [shape: f32[1], index: 0, kind: input, shape index: {}]   ;;  %s374_s1 = inlined_call_operand.<no memory space> [shape: f32[1], index: 1, kind: input, shape index: {}]   ;;  %s375_s2 = inlined_call_operand.hbm [shape: f32[8,32], index: 2, kind: input, shape index: {}]   ;;  %s376_s3 = inlined_call_operand.hbm [shape: f32[32,128], index: 3, kind: input, shape index: {}]   ;;  %s377_s4 = inlined_call_operand.hbm [shape: f32[8,128], index: 4, kind: output, shape index: {}]  }
   0x1   :  { %12 = vsyncpa [#allocation8], 0 }
   0x2   :  { %13 = vsyncpa [#allocation6], 0  ;;  %s283_s15 = smov [#allocation4]   ;;  %s284_s17 = smov [#allocation7]  }
   0x3   :  { %s24_s16 = sshll.u32 %s283_s15, 4  ;;  %s33_s18 = sshll.u32 %s284_s17, 4  ;;  %s25_s16 = int_to_ptr.vmem [resolvable:$true] %s24_s16  ;;  %s316_s18 = int_to_ptr.vmem [resolvable:$true] %s33_s18 }
   0x4   :  { %s211_s21 = scalar_lea.hbm %s375_s2, 128 }
   0x5   :  { %p212_p0 = scmp.ne.s32.totalorder %s375_s2, %s211_s21  ;;  %p215_p1 = scmp.lt.u32.totalorder %s211_s21, %s375_s2 }
   0x7   :  { %p217_p2 = pnand %p215_p1, %p212_p0 }
   0x9   :  { %220 = shalt.err (!%p217_p2)
}
   0xa   :  { %s221_s26 = scalar_lea.vmem %s25_s16, 128  ;;  %p226_p4 = scmp.lt.s32.totalorder %s25_s16, %s25_s16 }
   0xb   :  { %p222_p3 = scmp.ne.s32.totalorder %s25_s16, %s221_s26  ;;  %p227_p5 = scmp.lt.s32.totalorder %s221_s26, %s221_s26 }
   0xd   :  { %p228_p6 = por %p227_p5, %p226_p4 }
   0xf   :  { %p229_p7 = pnand %p228_p6, %p222_p3 }
  0x11   :  { %232 = shalt.err (!%p229_p7)
}
  0x12   :  { %27 = dma.hbm_to_vmem [thread:$0]  %s375_s2, 128, %s25_s16, [#allocation5]  }
  0x13   :  { %s233_s5 = scalar_lea.hbm %s376_s3, 512 }
  0x14   :  { %p234_p8 = scmp.ne.s32.totalorder %s376_s3, %s233_s5  ;;  %p237_p9 = scmp.lt.u32.totalorder %s233_s5, %s376_s3 }
  0x16   :  { %p239_p10 = pnand %p237_p9, %p234_p8 }
  0x18   :  { %242 = shalt.err (!%p239_p10)
}
  0x19   :  { %s243_s10 = scalar_lea.vmem %s316_s18, 512  ;;  %p248_p12 = scmp.lt.s32.totalorder %s316_s18, %s316_s18 }
  0x1a   :  { %p244_p11 = scmp.ne.s32.totalorder %s316_s18, %s243_s10  ;;  %p249_p13 = scmp.lt.s32.totalorder %s243_s10, %s243_s10 }
  0x1c   :  { %p250_p0 = por %p249_p13, %p248_p12 }
  0x1e   :  { %p251_p1 = pnand %p250_p0, %p244_p11 }
  0x20   :  { %254 = shalt.err (!%p251_p1)
}
  0x21   :  { %s285_s2 = smov 128   ;;  %s286_s11 = smov 8  }
  0x22   :  { %39 = dma.hbm_to_vmem [thread:$0]  %s376_s3, 512, %s316_s18, [#allocation8], %s285_s2, %s285_s2, %s286_s11  }
  0x23   :  { %277 = dma.done.wait [#allocation5], 128  }
  0x24   :  { %278 = vsyncadd [#allocation5], 4294967168 }
  0x25   :  { %279 = dma.done.wait [#allocation8], 512  }
  0x26   :  { %280 = vsyncadd [#allocation8], 4294966784  ;;  %v287_v0 = vmov 0.0|0.0   ;;  %vm288_vm0 = vmmov 0   ;;  %v289_v1 = vmov 0.0   ;;  %v49_v2 = vld [vmem:[#allocation7] sm:$0xff]  ;;  %s127_s15 = smul.f32 %s373_s0, %s373_s0  ;;  %v140_v21 = vstv %s373_s0 }
  0x27   :  { %193 = vmatprep.subr.bf16.mxu0 %v287_v0  ;;  %190 = vmatprep.mubr.msk.f32.mxu0 %vm288_vm0, %v289_v1  ;;  %v50_v3 = vld [vmem:[#allocation7 + $0x8] sm:$0xff]  ;;  %v51_v4 = vld [vmem:[#allocation7 + $0x10] sm:$0xff]  ;;  %v52_v6 = vld [vmem:[#allocation7 + $0x18] sm:$0xff]  ;;  %vm53_vm1 = vcmask 261120   ;;  %s133_s20 = smul.f32 %s374_s1, %s374_s1  ;;  %v148_v27 = vlaneseq  ;;  %s290_s1 = smov [#allocation9]  }
  0x28   :  { %v194_v5 = vpack.c.bf16 %v50_v3, %v49_v2  ;;  %v197_v7 = vpack.c.bf16 %v52_v6, %v51_v4  ;;  %v48_v8 = vld [vmem:[#allocation4] sm:$0xff]  ;;  %s128_s16 = sadd.f32 1.0, %s127_s15  ;;  %s166_s26 = sshll.u32 %s290_s1, 4  ;;  %s167_s26 = int_to_ptr.vmem [resolvable:$true] %s166_s26 }
  0x29   :  { %s129_s17 = sadd.f32 2.0, %s127_s15  ;;  %v134_v15 = vstv %s133_s20  ;;  %v149_v28 = vand.u32 127, %v148_v27  ;;  %p260_p3 = scmp.lt.s32.totalorder %s167_s26, %s167_s26 }
  0x2a   :  { %195 = vmatpush3.bf16.msra.mxu0 %v194_v5  ;;  %v138_v10 = vstv %s128_s16 }
  0x2b   :  { %196 = vmatprep.subr.bf16.mxu0 %v287_v0  ;;  %v130_v9 = vstv %s129_s17  ;;  %s143_s23 = smul.f32 %s129_s17, %s373_s0  ;;  %vm150_vm2 = vcmp.lt.s32.totalorder %v149_v28, 16  ;;  %vm156_vm3 = vcmp.eq.s32.totalorder %v149_v28, 16  ;;  %s255_s0 = scalar_lea.vmem %s167_s26, 128 }
  0x2c   :  { %p256_p2 = scmp.ne.s32.totalorder %s167_s26, %s255_s0  ;;  %p261_p4 = scmp.lt.s32.totalorder %s255_s0, %s255_s0 }
  0x2d   :  { %v144_v18 = vstv %s143_s23 }
  0x2e   :  { %198 = vmatpush3.bf16.msra.mxu0 %v197_v7  ;;  %p262_p5 = por %p261_p4, %p260_p3 }
  0x30   :  { %p263_p6 = pnand %p262_p5, %p256_p2 }
  0x31   :  { %191 = vmatmul.mubr.msk.f32.vlgmr.msra.gmra.mrb[0].mxu0 %vm53_vm1, %v48_v8 }
 0x104   :  { %v123_v11 = vpop.f32.mrb[0].mxu0 }
 0x105   :  { %v131_v12 = vmul.f32 %v130_v9, %v123_v11  ;;  %v139_v13 = vmul.f32 %v138_v10, %v123_v11  ;;  %v192_v14 = vpop.f32.mrb[1].mxu0  ;;  %v145_v19 = vmul.f32 %v144_v18, %v123_v11 }
 0x107   :  { %v132_v16 = vmul.f32 %v131_v12, %v123_v11 }
 0x109   :  { %v135_v17 = vadd.f32 %v134_v15, %v132_v16 }
 0x10b   :  { %207 = vrsqrt.f32 %v135_v17 }
 0x115   :  { %v208_v20 = vpop.eup %207 }
 0x116   :  { %v137_v22 = vmul.f32 %v208_v20, %v135_v17  ;;  %v146_v23 = vmul.f32 %v208_v20, %v145_v19 }
 0x118   :  { %v147_v24 = vadd.f32 %v146_v23, %v138_v10  ;;  %v141_v25 = vmul.f32 %v140_v21, %v137_v22 }
 0x11a   :  { %209 = vlog2.f32 %v147_v24  ;;  %v142_v26 = vadd.f32 %v141_v25, %v139_v13 }
 0x124   :  { %v210_v29 = vpop.eup %209 }
 0x125   :  { %v152_v30 = vmul.f32 0.6931472, %v210_v29 }
 0x127   :  { %v153_v31 = vsel %vm150_vm2, %v152_v30, 0.0 }
 0x128   :  { %154 = vadd.xlane.f32.xlu0 %v153_v31 }
 0x1b5   :  { %v155_v32 = vpop.xlane.xlu0 %154 }
 0x1b6   :  { %v157_v33 = vsel %vm156_vm3, %v155_v32, 0.0 }
 0x1b7   :  { %v158_v34 = vsel %vm150_vm2, %v142_v26, %v157_v33 }
 0x1b8   :  { %159 = vst [vmem:[#allocation9] sm:$0xff] %v158_v34 }
 0x1b9   :  { %266 = shalt.err (!%p263_p6)
}
 0x1ba   :  { %s267_s29 = scalar_lea.hbm %s377_s4, 128 }
 0x1bb   :  { %p268_p7 = scmp.ne.s32.totalorder %s377_s4, %s267_s29  ;;  %p271_p8 = scmp.lt.u32.totalorder %s267_s29, %s377_s4 }
 0x1bd   :  { %p273_p9 = pnand %p271_p8, %p268_p7 }
 0x1bf   :  { %276 = shalt.err (!%p273_p9)
}
 0x1c0   :  { %169 = dma.vmem_to_hbm [thread:$0]  %s167_s26, 128, %s377_s4, [#allocation6]  }
 0x1c1   :  { %281 = dma.done.wait [#allocation6], 128  }
 0x1c2   :  { %282 = vsyncadd [#allocation6], 4294967168 }
 0x1c3   :  { %173 = vsyncpa [#allocation5], 1 }
 0x1c4   :  { %174 = vsyncpa [#allocation8], 1 }
 0x1c5   :  { %175 = vsyncpa [#allocation6], 1 }

</bundles_post_ra>
